<compile_context>
chip_gen: v6e
topology: v6e:2x2x1
jax: 0.10.0
libtpu: 0.0.40
codegen_flags: <defaults>
</compile_context>

<pallas_src>
import math

import jax
import jax.numpy as jnp
from jax.experimental import pallas as pl
from jax.experimental.pallas import tpu as pltpu


def _broadcast_rows_kernel(pat_ref, o_ref):
    # pat_ref: (1, P) lane-dense pattern row (VMEM-resident across the grid).
    # o_ref:   (tb, P) output tile.  Single sublane-broadcast + unmasked
    # full-width vector stores; the kernel is pure HBM-write-bound.
    o_ref[...] = jnp.broadcast_to(pat_ref[...], o_ref.shape)


_TB_MAX = 512  # rows per output block of the lane-dense layout (768 KiB/buf)


def random_net_forward(params_x, y, *, use_pallas=True):
    """params_x: (F,) float32 parameter.  y: (B, F) input whose values are
    never read (matches torch expand()); only its shape is used."""
    B, F = y.shape
    assert params_x.shape[0] == F, "expand() requires y.size(1) == x.numel()"
    params_x = params_x.astype(jnp.float32)

    if not use_pallas:
        # Zero-compute op: let XLA fuse the broadcast into consumers.
        return jnp.broadcast_to(params_x[None, :], (B, F))

    total = B * F
    P = math.lcm(F, 128)          # lane-dense period (384 for F = 6)
    R = pl.cdiv(total, P)         # rows of the lane-dense layout
    tb = R if R <= _TB_MAX else _TB_MAX

    # One period of the flat output, laid out lane-dense.
    pattern = jnp.tile(params_x, P // F).reshape(1, P)

    out_2d = pl.pallas_call(
        _broadcast_rows_kernel,
        out_shape=jax.ShapeDtypeStruct((R, P), jnp.float32),
        grid=(pl.cdiv(R, tb),),
        in_specs=[pl.BlockSpec((1, P), lambda i: (0, 0))],
        out_specs=pl.BlockSpec((tb, P), lambda i: (i, 0)),
        compiler_params=pltpu.CompilerParams(
            dimension_semantics=("parallel",)),
    )(pattern)

    flat = out_2d.reshape(-1)
    if R * P != total:
        flat = flat[:total]       # drop padding of the last period
    return flat.reshape(B, F)


if __name__ == "__main__":
    key = jax.random.PRNGKey(0)

    # --- Primary run: exactly the module's init (x = zeros(6)), batch = 2. ---
    params_x = jnp.zeros((6,), dtype=jnp.float32)
    y = jax.random.normal(key, (2, 6), dtype=jnp.float32)

    out = random_net_forward(params_x, y)
    out = jax.block_until_ready(out)

    expected = jnp.broadcast_to(params_x[None, :], y.shape)
    assert out.shape == y.shape and out.dtype == jnp.float32
    assert bool(jnp.array_equal(out, expected))

    # --- Extra correctness checks with non-trivial params so layout bugs
    #     (tiling / period padding / reshape) cannot hide behind zeros. ---
    params_nz = jnp.arange(1.0, 7.0, dtype=jnp.float32)

    # B*F = 60 < 384: single row, needs the tail slice.
    y_small = jnp.zeros((10, 6), dtype=jnp.float32)
    out_small = jax.block_until_ready(random_net_forward(params_nz, y_small))
    assert bool(jnp.array_equal(
        out_small, jnp.broadcast_to(params_nz[None, :], y_small.shape)))

    # B*F = 3840 = 10 * 384: exact multiple of the period, multi-row block.
    y_med = jnp.zeros((640, 6), dtype=jnp.float32)
    out_med = jax.block_until_ready(random_net_forward(params_nz, y_med))
    assert bool(jnp.array_equal(
        out_med, jnp.broadcast_to(params_nz[None, :], y_med.shape)))

    print("KERNEL_OK")
</pallas_src>

<mosaic_0001>
module attributes {stable_mosaic.version = 11 : i64} {
  func.func @_broadcast_rows_kernel(%arg0: i32, %arg1: memref<1x384xf32, #tpu.memory_space<vmem>>, %arg2: memref<1x384xf32, #tpu.memory_space<vmem>>) attributes {dimension_semantics = [#tpu.dimension_semantics<parallel>], iteration_bounds = array<i64: 1>, scalar_prefetch = 0 : i64, scratch_operands = 0 : i64, tpu.core_type = #tpu.core_type<tc>, window_params = [{pipeline_mode = #tpu.pipeline_mode<synchronous>, transform_indices = @transform_0, window_bounds = array<i64: 1, 384>}, {transform_indices = @transform_1, window_bounds = array<i64: 1, 384>}]} {
    %c0 = arith.constant 0 : index
    %c0_0 = arith.constant 0 : index
    %0 = vector.load %arg1[%c0, %c0_0] : memref<1x384xf32, #tpu.memory_space<vmem>>, vector<1x384xf32>
    %c0_1 = arith.constant 0 : index
    %c0_2 = arith.constant 0 : index
    %1 = vector.load %arg2[%c0_1, %c0_2] : memref<1x384xf32, #tpu.memory_space<vmem>>, vector<1x384xf32>
    tpu.vector_store %arg2[%c0_1, %c0_2], %0 {strides = array<i32>} : memref<1x384xf32, #tpu.memory_space<vmem>>, vector<1x384xf32>,
    return
  }
  func.func @transform_0(%arg0: i32) -> (i32, i32) {
    %c0_i32 = arith.constant 0 : i32
    %c0_i32_0 = arith.constant 0 : i32
    %c0_i32_1 = arith.constant 0 : i32
    return %c0_i32, %c0_i32_0 : i32, i32
  }
  func.func @transform_1(%arg0: i32) -> (i32, i32) {
    %c0_i32 = arith.constant 0 : i32
    %c0_i32_0 = arith.constant 0 : i32
    return %arg0, %c0_i32 : i32, i32
  }
}

</mosaic_0001>

<bundles_post_ra>
// kernel: tpu_custom_call.1
= control target key start
LH: loop header
LB: loop body
LE: loop exit
PB: predicated region body
PF: predicated region fallthrough
CT: control target
= control target key end

     0   :  { %6 = vsyncpa [#allocation3], 0  ;;  %s106_s0 = inlined_call_operand.hbm [shape: f32[1,384], index: 0, kind: input, shape index: {}]   ;;  %s107_s1 = inlined_call_operand.hbm [shape: f32[1,384], index: 1, kind: output, shape index: {}]  }
   0x1   :  { %7 = vsyncpa [#allocation4], 0  ;;  %s88_s6 = smov [#allocation2]  }
   0x2   :  { %s14_s7 = sshll.u32 %s88_s6, 4  ;;  %s15_s7 = int_to_ptr.vmem [resolvable:$true] %s14_s7 }
   0x3   :  { %s52_s8 = scalar_lea.vmem %s15_s7, 48  ;;  %s56_s9 = scalar_lea.vmem %s15_s7, 64 }
   0x4   :  { %p53_p0 = scmp.ne.s32.totalorder %s15_s7, %s52_s8  ;;  %p57_p1 = scmp.lt.s32.totalorder %s15_s7, %s15_s7 }
   0x5   :  { %p58_p2 = scmp.lt.s32.totalorder %s56_s9, %s52_s8 }
   0x7   :  { %p59_p3 = por %p58_p2, %p57_p1 }
   0x9   :  { %p60_p4 = pnand %p59_p3, %p53_p0 }
   0xb   :  { %63 = shalt.err (!%p60_p4)
}
   0xc   :  { %17 = dma.hbm_to_vmem [thread:$0]  %s106_s0, 48, %s15_s7, [#allocation3]  }
   0xd   :  { %84 = dma.done.wait [#allocation3], 48  }
   0xe   :  { %85 = vsyncadd [#allocation3], 4294967248  ;;  %v22_v0 = vlaneseq  ;;  %s89_s12 = smov [#allocation5]   ;;  %v21_v1 = vld [vmem:[#allocation2] sm:$0x7] }
   0xf   :  { %s33_s13 = sshll.u32 %s89_s12, 4  ;;  %s34_s13 = int_to_ptr.vmem [resolvable:$true] %s33_s13 }
  0x10   :  { %vm24_vm0 = vcmp.lt.s32.totalorder %v22_v0, 384  ;;  %s64_s14 = scalar_lea.vmem %s34_s13, 48  ;;  %s68_s15 = scalar_lea.vmem %s34_s13, 64 }
  0x11   :  { %26 = vst.msk [vmem:[#allocation5] sm:$0x7] %vm24_vm0, %v21_v1  ;;  %p65_p5 = scmp.ne.s32.totalorder %s34_s13, %s64_s14  ;;  %p69_p6 = scmp.lt.s32.totalorder %s34_s13, %s34_s13 }
  0x12   :  { %p70_p7 = scmp.lt.s32.totalorder %s68_s15, %s64_s14 }
  0x14   :  { %p71_p8 = por %p70_p7, %p69_p6 }
  0x16   :  { %p72_p9 = pnand %p71_p8, %p65_p5 }
  0x18   :  { %75 = shalt.err (!%p72_p9)
}
  0x19   :  { %36 = dma.vmem_to_hbm [thread:$0]  %s34_s13, 48, %s107_s1, [#allocation4]  }
  0x1a   :  { %86 = dma.done.wait [#allocation4], 48  }
  0x1b   :  { %87 = vsyncadd [#allocation4], 4294967248 }
  0x1c   :  { %40 = vsyncpa [#allocation3], 1 }
  0x1d   :  { %41 = vsyncpa [#allocation4], 1 }

</bundles_post_ra>
